<compile_context>
chip_gen: v6e
topology: v6e:2x2x1
jax: 0.10.0
libtpu: 0.0.40
codegen_flags: <defaults>
</compile_context>

<pallas_src>
import functools

import jax
import jax.numpy as jnp
from jax import lax
from jax.experimental import pallas as pl
from jax.experimental.pallas import tpu as pltpu

INPUT_SIZE = 57
HIDDEN_SIZE = 128
OUTPUT_SIZE = 18

IN_PAD = 64       # K-padding of the x path (57 -> 64)
OUT_PAD = 128     # lane-dense classifier width (18 -> 128)
NEG_BIG = -1e30   # padded-logit bias: exp(NEG_BIG - m) == 0 in f32

MATMUL_DTYPE = jnp.float32   # set to jnp.bfloat16 on v6e/v7x


# ---------------------------------------------------------------------------
# Pass 1: x projection (parallel over chunks)
# ---------------------------------------------------------------------------
def _xproj_kernel(x_ref, wx_ref, bg_ref, xw_ref):
    # (chunk_rows, IN_PAD) @ (IN_PAD, 4H) + bias, accumulated in f32.
    x = x_ref[...].astype(wx_ref.dtype)
    xw_ref[...] = (jnp.dot(x, wx_ref[...], preferred_element_type=jnp.float32)
                   + bg_ref[...]).astype(xw_ref.dtype)


def _build_xproj(num_chunks, chunk_rows):
    h4 = 4 * HIDDEN_SIZE
    grid_spec = pltpu.PrefetchScalarGridSpec(
        num_scalar_prefetch=0,
        grid=(num_chunks,),
        in_specs=[
            pl.BlockSpec((chunk_rows, IN_PAD), lambda c: (c, 0)),   # x chunk
            pl.BlockSpec((IN_PAD, h4), lambda c: (0, 0)),           # wx
            pl.BlockSpec((1, h4), lambda c: (0, 0)),                # b_gates
        ],
        out_specs=pl.BlockSpec((chunk_rows, h4), lambda c: (c, 0)),
    )
    return pl.pallas_call(
        _xproj_kernel,
        out_shape=jax.ShapeDtypeStruct((num_chunks * chunk_rows, h4),
                                       jnp.float32),
        grid_spec=grid_spec,
        compiler_params=pltpu.CompilerParams(
            dimension_semantics=("parallel",)),
    )


# ---------------------------------------------------------------------------
# Pass 2: serial recurrence, t_blk timesteps per grid iteration
# ---------------------------------------------------------------------------
def _recurrence_kernel(xw_ref, h0_ref, c0_ref, wh_ref,
                       hseq_ref, hT_ref, cT_ref, oT_ref,
                       *, t_blk, b_pad, t_real, t_pad):
    H = HIDDEN_SIZE
    chunk = pl.program_id(0)

    @pl.when(chunk == 0)
    def _():
        hT_ref[...] = h0_ref[...]
        cT_ref[...] = c0_ref[...]

    wh = wh_ref[...]            # resident weight, already in MATMUL_DTYPE
    h_in = hT_ref[...]          # carry from previous chunk (or h0)
    c_in = cT_ref[...]

    def step(s, carry):
        h, c, o_prev = carry
        row = pl.multiple_of(s * b_pad, 8)
        # Gate pre-activations: hoisted x-path (xw) + serial h-path.
        gates = (xw_ref[pl.ds(row, b_pad), :]
                 + jnp.dot(h.astype(wh.dtype), wh,
                           preferred_element_type=jnp.float32))
        f_t = jax.nn.sigmoid(gates[:, 0 * H:1 * H])     # f_gate
        i_t = jax.nn.sigmoid(gates[:, 1 * H:2 * H])     # i_gate_1
        C_t = jnp.tanh(gates[:, 2 * H:3 * H])           # i_gate_2
        o_t = jax.nn.sigmoid(gates[:, 3 * H:4 * H])     # o_gate
        c_next = f_t * c + i_t * C_t
        h_t = o_t * jnp.tanh(c_next)
        if t_pad != t_real:     # static: only emitted if T was padded
            valid = (chunk * t_blk + s) < t_real
            h_t = jnp.where(valid, h_t, h)
            c_next = jnp.where(valid, c_next, c)
            o_t = jnp.where(valid, o_t, o_prev)
        hseq_ref[pl.ds(row, b_pad), :] = h_t.astype(hseq_ref.dtype)
        return (h_t, c_next, o_t)

    h_f, c_f, o_f = lax.fori_loop(0, t_blk, step,
                                  (h_in, c_in, jnp.zeros_like(h_in)),
                                  unroll=(t_blk <= 8))

    # Carry written back once per chunk (resident output refs).
    hT_ref[...] = h_f
    cT_ref[...] = c_f

    @pl.when(chunk == pl.num_programs(0) - 1)
    def _():
        oT_ref[...] = o_f


def _build_recurrence(num_chunks, t_blk, b_pad, t_real, t_pad):
    H, h4 = HIDDEN_SIZE, 4 * HIDDEN_SIZE
    chunk_rows = t_blk * b_pad
    kernel = functools.partial(_recurrence_kernel, t_blk=t_blk, b_pad=b_pad,
                               t_real=t_real, t_pad=t_pad)

    def resident(shape):
        return pl.BlockSpec(shape, lambda c: tuple(0 for _ in shape))

    grid_spec = pltpu.PrefetchScalarGridSpec(
        num_scalar_prefetch=0,
        grid=(num_chunks,),
        in_specs=[
            pl.BlockSpec((chunk_rows, h4), lambda c: (c, 0)),   # xw chunk
            resident((b_pad, H)),                               # h0
            resident((b_pad, H)),                               # c0
            resident((H, h4)),                                  # wh
        ],
        out_specs=(
            pl.BlockSpec((chunk_rows, H), lambda c: (c, 0)),    # h per step
            resident((b_pad, H)),                               # h_T (carry)
            resident((b_pad, H)),                               # c_T (carry)
            resident((b_pad, H)),                               # o_T (last)
        ),
    )
    out_shape = (
        jax.ShapeDtypeStruct((num_chunks * chunk_rows, H), jnp.float32),
        jax.ShapeDtypeStruct((b_pad, H), jnp.float32),
        jax.ShapeDtypeStruct((b_pad, H), jnp.float32),
        jax.ShapeDtypeStruct((b_pad, H), jnp.float32),
    )
    return pl.pallas_call(
        kernel, out_shape=out_shape, grid_spec=grid_spec,
        compiler_params=pltpu.CompilerParams(
            dimension_semantics=("arbitrary",)),   # sequential recurrence
    )


# ---------------------------------------------------------------------------
# Pass 3: classifier + log_softmax (parallel over chunks)
# ---------------------------------------------------------------------------
def _classifier_kernel(h_ref, wc_ref, bc_ref, logp_ref):
    logits = (jnp.dot(h_ref[...].astype(wc_ref.dtype), wc_ref[...],
                      preferred_element_type=jnp.float32)
              + bc_ref[...])                               # (rows, 128)
    m = jnp.max(logits, axis=1, keepdims=True)
    shifted = logits - m
    lse = jnp.log(jnp.sum(jnp.exp(shifted), axis=1, keepdims=True))
    logp_ref[...] = (shifted - lse).astype(logp_ref.dtype)


def _build_classifier(num_chunks, chunk_rows):
    H = HIDDEN_SIZE
    grid_spec = pltpu.PrefetchScalarGridSpec(
        num_scalar_prefetch=0,
        grid=(num_chunks,),
        in_specs=[
            pl.BlockSpec((chunk_rows, H), lambda c: (c, 0)),    # h chunk
            pl.BlockSpec((H, OUT_PAD), lambda c: (0, 0)),       # wc
            pl.BlockSpec((1, OUT_PAD), lambda c: (0, 0)),       # bc (padded)
        ],
        out_specs=pl.BlockSpec((chunk_rows, OUT_PAD), lambda c: (c, 0)),
    )
    return pl.pallas_call(
        _classifier_kernel,
        out_shape=jax.ShapeDtypeStruct((num_chunks * chunk_rows, OUT_PAD),
                                       jnp.float32),
        grid_spec=grid_spec,
        compiler_params=pltpu.CompilerParams(
            dimension_semantics=("parallel",)),
    )


# ---------------------------------------------------------------------------
# Wrappers
# ---------------------------------------------------------------------------
def mylstm_sequence(x_seq, hc, padded_params, *, t_blk=8):
    """Run T timesteps.  x_seq: (T, B, 57); hc = (h0 (B,128), c0 (B,128)).
    Returns (logp_seq (T, B, 18), (h_T, o_T, c_T))."""
    wx, wh, bg, wc, bc = padded_params
    h0, c0 = hc
    T, B, _ = x_seq.shape
    B_pad = max(8, ((B + 7) // 8) * 8)
    t_blk = max(1, min(t_blk, T))
    num_chunks = (T + t_blk - 1) // t_blk
    T_pad = num_chunks * t_blk
    chunk_rows = t_blk * B_pad

    x_p = jnp.zeros((T_pad, B_pad, IN_PAD), jnp.float32)
    x_p = x_p.at[:T, :B, :INPUT_SIZE].set(x_seq.astype(jnp.float32))
    x2 = x_p.reshape(T_pad * B_pad, IN_PAD)
    h_p = jnp.zeros((B_pad, HIDDEN_SIZE), jnp.float32).at[:B].set(h0)
    c_p = jnp.zeros((B_pad, HIDDEN_SIZE), jnp.float32).at[:B].set(c0)

    # Pass 1: hoisted x-projection (+ gate bias), parallel over chunks.
    xw2 = _build_xproj(num_chunks, chunk_rows)(x2, wx, bg)

    # Pass 2: serial recurrence, t_blk steps per grid iteration.
    hseq2, hT_p, cT_p, oT_p = _build_recurrence(
        num_chunks, t_blk, B_pad, T, T_pad)(xw2, h_p, c_p, wh)

    # Pass 3: classifier + log_softmax, parallel over chunks.
    logp2 = _build_classifier(num_chunks, chunk_rows)(hseq2, wc, bc)

    logp = logp2.reshape(T_pad, B_pad, OUT_PAD)[:T, :B, :OUTPUT_SIZE]
    return logp, (hT_p[:B], oT_p[:B], cT_p[:B])


def mylstm_forward(x, hc, padded_params):
    """Single-step forward matching the PyTorch module:
    returns (log_softmax_output, (h_t, o_t))."""
    logp_seq, (h_t, o_t, _c_t) = mylstm_sequence(x[None], hc, padded_params,
                                                 t_blk=1)
    return logp_seq[0], (h_t, o_t)


# ---------------------------------------------------------------------------
# Parameters
# ---------------------------------------------------------------------------
def init_params(key):
    """Fused (unpadded) params mimicking nn.Linear uniform(-1/sqrt(in), ...)."""
    in_gate = INPUT_SIZE + HIDDEN_SIZE  # 185
    ks = jax.random.split(key, 10)

    def linear(kw, kb, fan_in, fan_out):
        bound = 1.0 / jnp.sqrt(fan_in)
        w = jax.random.uniform(kw, (fan_in, fan_out), jnp.float32, -bound, bound)
        b = jax.random.uniform(kb, (1, fan_out), jnp.float32, -bound, bound)
        return w, b

    # gate order: f, i1 (sigmoid), i2 (tanh), o
    w_f, b_f = linear(ks[0], ks[1], in_gate, HIDDEN_SIZE)
    w_i1, b_i1 = linear(ks[2], ks[3], in_gate, HIDDEN_SIZE)
    w_i2, b_i2 = linear(ks[4], ks[5], in_gate, HIDDEN_SIZE)
    w_o, b_o = linear(ks[6], ks[7], in_gate, HIDDEN_SIZE)
    w_cls, b_cls = linear(ks[8], ks[9], HIDDEN_SIZE, OUTPUT_SIZE)

    w_gates = jnp.concatenate([w_f, w_i1, w_i2, w_o], axis=1)   # (185, 512)
    b_gates = jnp.concatenate([b_f, b_i1, b_i2, b_o], axis=1)   # (1, 512)

    wx = w_gates[:INPUT_SIZE, :]    # (57, 512)  — multiplies `input`
    wh = w_gates[INPUT_SIZE:, :]    # (128, 512) — multiplies `hidden`
    return wx, wh, b_gates, w_cls, b_cls


def prepare_params(params, matmul_dtype=MATMUL_DTYPE):
    """Pad / cast params to the kernels' TPU-friendly shapes (do once)."""
    wx, wh, bg, wc, bc = params
    wx_p = (jnp.zeros((IN_PAD, 4 * HIDDEN_SIZE), jnp.float32)
            .at[:INPUT_SIZE].set(wx).astype(matmul_dtype))
    wh_p = wh.astype(matmul_dtype)
    wc_p = (jnp.zeros((HIDDEN_SIZE, OUT_PAD), jnp.float32)
            .at[:, :OUTPUT_SIZE].set(wc).astype(matmul_dtype))
    bc_p = jnp.full((1, OUT_PAD), NEG_BIG, jnp.float32).at[:, :OUTPUT_SIZE].set(bc)
    return wx_p, wh_p, bg, wc_p, bc_p


# ---------------------------------------------------------------------------
# Pure-JAX references
# ---------------------------------------------------------------------------
def reference_step(x, h, c, params):
    wx, wh, bg, wc, bc = params
    gates = x @ wx + h @ wh + bg
    H = HIDDEN_SIZE
    f = jax.nn.sigmoid(gates[:, :H])
    i = jax.nn.sigmoid(gates[:, H:2 * H])
    C = jnp.tanh(gates[:, 2 * H:3 * H])
    o = jax.nn.sigmoid(gates[:, 3 * H:4 * H])
    c_next = f * c + i * C
    h_t = o * jnp.tanh(c_next)
    logits = h_t @ wc + bc
    return jax.nn.log_softmax(logits, axis=1), h_t, o, c_next


def reference_sequence(x_seq, h0, c0, params):
    def step(carry, x):
        h, c = carry
        logp, h_t, o_t, c_next = reference_step(x, h, c, params)
        return (h_t, c_next), (logp, o_t)
    (hT, cT), (logps, o_ts) = jax.lax.scan(step, (h0, c0), x_seq)
    return logps, hT, o_ts[-1], cT


if __name__ == "__main__":
    key = jax.random.PRNGKey(0)
    k_p, k_x, k_h, k_c = jax.random.split(key, 4)

    B, T = 2, 8
    params = init_params(k_p)
    pparams = prepare_params(params)

    x_seq = jax.random.normal(k_x, (T, B, INPUT_SIZE), jnp.float32)
    h0 = jax.random.normal(k_h, (B, HIDDEN_SIZE), jnp.float32)
    c0 = jax.random.normal(k_c, (B, HIDDEN_SIZE), jnp.float32)

    # --- single step: matches the PyTorch module's forward exactly ---
    logp, (h_t, o_t) = mylstm_forward(x_seq[0], (h0, c0), pparams)
    jax.block_until_ready((logp, h_t, o_t))
    logp_r, h_r, o_r, _ = reference_step(x_seq[0], h0, c0, params)
    assert jnp.allclose(logp, logp_r, atol=1e-5), "step log_softmax mismatch"
    assert jnp.allclose(h_t, h_r, atol=1e-5), "step h_t mismatch"
    assert jnp.allclose(o_t, o_r, atol=1e-5), "step o_t mismatch"

    # --- full sequence: chunked serial recurrence, parallel x-proj/classifier ---
    logp_seq, (hT, oT, cT) = mylstm_sequence(x_seq, (h0, c0), pparams, t_blk=8)
    jax.block_until_ready((logp_seq, hT, oT, cT))
    logp_sr, hT_r, oT_r, cT_r = reference_sequence(x_seq, h0, c0, params)
    assert jnp.allclose(logp_seq, logp_sr, atol=1e-4), "seq log_softmax mismatch"
    assert jnp.allclose(hT, hT_r, atol=1e-4), "seq h_T mismatch"
    assert jnp.allclose(oT, oT_r, atol=1e-4), "seq o_T mismatch"
    assert jnp.allclose(cT, cT_r, atol=1e-4), "seq c_T mismatch"

    print("KERNEL_OK")
</pallas_src>

<mosaic_0001>
module attributes {stable_mosaic.version = 11 : i64} {
  func.func @_xproj_kernel(%arg0: i32, %arg1: memref<8x64xf32, #tpu.memory_space<vmem>>, %arg2: memref<64x512xf32, #tpu.memory_space<vmem>>, %arg3: memref<1x512xf32, #tpu.memory_space<vmem>>, %arg4: memref<8x512xf32, #tpu.memory_space<vmem>>) attributes {dimension_semantics = [#tpu.dimension_semantics<parallel>], iteration_bounds = array<i64: 1>, scalar_prefetch = 0 : i64, scratch_operands = 0 : i64, tpu.core_type = #tpu.core_type<tc>, window_params = [{transform_indices = @transform_0, window_bounds = array<i64: 8, 64>}, {pipeline_mode = #tpu.pipeline_mode<synchronous>, transform_indices = @transform_1, window_bounds = array<i64: 64, 512>}, {pipeline_mode = #tpu.pipeline_mode<synchronous>, transform_indices = @transform_2, window_bounds = array<i64: 1, 512>}, {transform_indices = @transform_3, window_bounds = array<i64: 8, 512>}]} {
    %c0 = arith.constant 0 : index
    %c0_0 = arith.constant 0 : index
    %0 = vector.load %arg1[%c0, %c0_0] : memref<8x64xf32, #tpu.memory_space<vmem>>, vector<8x64xf32>
    %c0_1 = arith.constant 0 : index
    %c0_2 = arith.constant 0 : index
    %1 = vector.load %arg2[%c0_1, %c0_2] : memref<64x512xf32, #tpu.memory_space<vmem>>, vector<64x512xf32>
    %cst = arith.constant dense<0.000000e+00> : vector<8x512xf32>
    %2 = tpu.matmul %0, %1, %cst {dimension_numbers = #tpu.dot_dimension_numbers<[1], [0], [0], [1], [0, 0, 1, 1], [], []>} : vector<8x64xf32>, vector<64x512xf32>, vector<8x512xf32> -> vector<8x512xf32>
    %c0_3 = arith.constant 0 : index
    %c0_4 = arith.constant 0 : index
    %3 = vector.load %arg3[%c0_3, %c0_4] : memref<1x512xf32, #tpu.memory_space<vmem>>, vector<1x512xf32>
    %4 = vector.broadcast %3 : vector<1x512xf32> to vector<8x512xf32>
    %5 = arith.addf %2, %4 : vector<8x512xf32>
    %c0_5 = arith.constant 0 : index
    %c0_6 = arith.constant 0 : index
    %6 = vector.load %arg4[%c0_5, %c0_6] : memref<8x512xf32, #tpu.memory_space<vmem>>, vector<8x512xf32>
    tpu.vector_store %arg4[%c0_5, %c0_6], %5 {strides = array<i32>} : memref<8x512xf32, #tpu.memory_space<vmem>>, vector<8x512xf32>,
    return
  }
  func.func @transform_0(%arg0: i32) -> (i32, i32) {
    %c0_i32 = arith.constant 0 : i32
    %c0_i32_0 = arith.constant 0 : i32
    return %arg0, %c0_i32 : i32, i32
  }
  func.func @transform_1(%arg0: i32) -> (i32, i32) {
    %c0_i32 = arith.constant 0 : i32
    %c0_i32_0 = arith.constant 0 : i32
    %c0_i32_1 = arith.constant 0 : i32
    return %c0_i32, %c0_i32_0 : i32, i32
  }
  func.func @transform_2(%arg0: i32) -> (i32, i32) {
    %c0_i32 = arith.constant 0 : i32
    %c0_i32_0 = arith.constant 0 : i32
    %c0_i32_1 = arith.constant 0 : i32
    return %c0_i32, %c0_i32_0 : i32, i32
  }
  func.func @transform_3(%arg0: i32) -> (i32, i32) {
    %c0_i32 = arith.constant 0 : i32
    %c0_i32_0 = arith.constant 0 : i32
    return %arg0, %c0_i32 : i32, i32
  }
}

</mosaic_0001>

<bundles_post_ra>
// kernel: tpu_custom_call.1
= control target key start
LH: loop header
LB: loop body
LE: loop exit
PB: predicated region body
PF: predicated region fallthrough
CT: control target
= control target key end

     0   :  { %8 = vsyncpa [#allocation3], 0  ;;  %s407_s0 = inlined_call_operand.hbm [shape: f32[8,64], index: 0, kind: input, shape index: {}]   ;;  %s408_s1 = inlined_call_operand.hbm [shape: f32[64,512], index: 1, kind: input, shape index: {}]   ;;  %s409_s2 = inlined_call_operand.hbm [shape: f32[1,512], index: 2, kind: input, shape index: {}]   ;;  %s410_s3 = inlined_call_operand.hbm [shape: f32[8,512], index: 3, kind: output, shape index: {}]  }
   0x1   :  { %9 = vsyncpa [#allocation6], 0 }
   0x2   :  { %10 = vsyncpa [#allocation4], 0  ;;  %s368_s12 = smov [#allocation5]  }
   0x3   :  { %s26_s13 = sshll.u32 %s368_s12, 4  ;;  %s27_s13 = int_to_ptr.vmem [resolvable:$true] %s26_s13 }
   0x4   :  { %s290_s14 = scalar_lea.vmem %s27_s13, 4096  ;;  %p295_p1 = scmp.lt.s32.totalorder %s27_s13, %s27_s13 }
   0x5   :  { %p291_p0 = scmp.ne.s32.totalorder %s27_s13, %s290_s14  ;;  %p296_p2 = scmp.lt.s32.totalorder %s290_s14, %s290_s14 }
   0x7   :  { %p297_p3 = por %p296_p2, %p295_p1 }
   0x9   :  { %p298_p4 = pnand %p297_p3, %p291_p0 }
   0xb   :  { %301 = shalt.err (!%p298_p4)
}
   0xc   :  { %s369_s15 = smov 512   ;;  %s370_s16 = smov 32  }
   0xd   :  { %32 = dma.hbm_to_vmem [thread:$0]  %s408_s1, 4096, %s27_s13, [#allocation6], %s369_s15, %s369_s15, %s370_s16  }
   0xe   :  { %s371_s19 = smov [#allocation2]   ;;  %s372_s21 = smov [#allocation7]  }
   0xf   :  { %s17_s20 = sshll.u32 %s371_s19, 4  ;;  %s39_s22 = sshll.u32 %s372_s21, 4  ;;  %s18_s20 = int_to_ptr.vmem [resolvable:$true] %s17_s20  ;;  %s40_s22 = int_to_ptr.vmem [resolvable:$true] %s39_s22 }
  0x10   :  { %s310_s23 = scalar_lea.vmem %s18_s20, 128  ;;  %p315_p6 = scmp.lt.s32.totalorder %s18_s20, %s18_s20 }
  0x11   :  { %p311_p5 = scmp.ne.s32.totalorder %s18_s20, %s310_s23  ;;  %p316_p7 = scmp.lt.s32.totalorder %s310_s23, %s310_s23 }
  0x13   :  { %p317_p8 = por %p316_p7, %p315_p6 }
  0x15   :  { %p318_p9 = pnand %p317_p8, %p311_p5 }
  0x17   :  { %321 = shalt.err (!%p318_p9)
}
  0x18   :  { %20 = dma.hbm_to_vmem [thread:$0]  %s407_s0, 128, %s18_s20, [#allocation3]  }
  0x19   :  { %s330_s26 = scalar_lea.vmem %s40_s22, 64  ;;  %p335_p11 = scmp.lt.s32.totalorder %s40_s22, %s40_s22 }
  0x1a   :  { %p331_p10 = scmp.ne.s32.totalorder %s40_s22, %s330_s26  ;;  %p336_p12 = scmp.lt.s32.totalorder %s330_s26, %s330_s26 }
  0x1c   :  { %p337_p13 = por %p336_p12, %p335_p11 }
  0x1e   :  { %p338_p0 = pnand %p337_p13, %p331_p10 }
  0x20   :  { %341 = shalt.err (!%p338_p0)
}
  0x21   :  { %42 = dma.hbm_to_vmem [thread:$0]  %s409_s2, 64, %s40_s22, [#allocation6]  }
  0x22   :  { %362 = dma.done.wait [#allocation3], 128  }
  0x23   :  { %363 = vsyncadd [#allocation3], 4294967168 }
  0x24   :  { %364 = dma.done.wait [#allocation6], 4160  }
  0x25   :  { %365 = vsyncadd [#allocation6], 4294963136  ;;  %v373_v0 = vmov 0.0   ;;  %v82_v1 = vld [vmem:[#allocation5 + $0xe8] sm:$0xff]  ;;  %v84_v2 = vld [vmem:[#allocation5 + $0xf8] sm:$0xff]  ;;  %vm107_vm0 = vcmask 523264   ;;  %v87_v34 = vlaneseq }
  0x26   :  { %175 = vmatprep.mubr.f32.mxu0 %v373_v0  ;;  %246 = vmatprep.mubr.f32.mxu1 %v373_v0  ;;  %v81_v3 = vld [vmem:[#allocation5 + $0xe0] sm:$0xff]  ;;  %v83_v4 = vld [vmem:[#allocation5 + $0xf0] sm:$0xff]  ;;  %v78_v5 = vld [vmem:[#allocation5 + $0xc8] sm:$0xff]  ;;  %s374_s0 = smov [#allocation8]  }
  0x27   :  { %127 = vmatprep.subr.mxu0 %v82_v1  ;;  %198 = vmatprep.subr.mxu1 %v84_v2  ;;  %v80_v6 = vld [vmem:[#allocation5 + $0xd8] sm:$0xff]  ;;  %v77_v7 = vld [vmem:[#allocation5 + $0xc0] sm:$0xff]  ;;  %v79_v8 = vld [vmem:[#allocation5 + $0xd0] sm:$0xff]  ;;  %v88_v35 = vshrl.u32 %v87_v34, 7  ;;  %s263_s2 = sshll.u32 %s374_s0, 4  ;;  %s264_s2 = int_to_ptr.vmem [resolvable:$true] %s263_s2 }
  0x28   :  { %128 = vmatpush1.msra.mxu0 %v81_v3  ;;  %199 = vmatpush1.msra.mxu1 %v83_v4  ;;  %v74_v9 = vld [vmem:[#allocation5 + $0xa8] sm:$0xff]  ;;  %v76_v10 = vld [vmem:[#allocation5 + $0xb8] sm:$0xff]  ;;  %v73_v11 = vld [vmem:[#allocation5 + $0xa0] sm:$0xff]  ;;  %s342_s28 = scalar_lea.vmem %s264_s2, 512  ;;  %p347_p2 = scmp.lt.s32.totalorder %s264_s2, %s264_s2 }
  0x29   :  { %129 = vmatprep.subr.mxu0 %v78_v5  ;;  %200 = vmatprep.subr.mxu1 %v80_v6  ;;  %v75_v12 = vld [vmem:[#allocation5 + $0xb0] sm:$0xff]  ;;  %v70_v13 = vld [vmem:[#allocation5 + $0x88] sm:$0xff]  ;;  %v72_v14 = vld [vmem:[#allocation5 + $0x98] sm:$0xff]  ;;  %v89_v36 = vsub.s32 0, %v88_v35  ;;  %v97_v37 = vsub.s32 2, %v88_v35  ;;  %v93_v39 = vsub.s32 1, %v88_v35  ;;  %p343_p1 = scmp.ne.s32.totalorder %s264_s2, %s342_s28  ;;  %p348_p3 = scmp.lt.s32.totalorder %s342_s28, %s342_s28 }
  0x2a   :  { %130 = vmatpush1.msra.mxu0 %v77_v7  ;;  %201 = vmatpush1.msra.mxu1 %v79_v8  ;;  %v69_v15 = vld [vmem:[#allocation5 + $0x80] sm:$0xff]  ;;  %v71_v16 = vld [vmem:[#allocation5 + $0x90] sm:$0xff]  ;;  %v66_v17 = vld [vmem:[#allocation5 + $0x68] sm:$0xff]  ;;  %v101_v40 = vsub.s32 3, %v88_v35 }
  0x2b   :  { %131 = vmatprep.subr.mxu0 %v74_v9  ;;  %202 = vmatprep.subr.mxu1 %v76_v10  ;;  %v68_v18 = vld [vmem:[#allocation5 + $0x78] sm:$0xff]  ;;  %v65_v19 = vld [vmem:[#allocation5 + $0x60] sm:$0xff]  ;;  %v67_v20 = vld [vmem:[#allocation5 + $0x70] sm:$0xff]  ;;  %p349_p4 = por %p348_p3, %p347_p2 }
  0x2c   :  { %132 = vmatpush1.msra.mxu0 %v73_v11  ;;  %203 = vmatpush1.msra.mxu1 %v75_v12  ;;  %v62_v21 = vld [vmem:[#allocation5 + $0x48] sm:$0xff]  ;;  %v64_v22 = vld [vmem:[#allocation5 + $0x58] sm:$0xff]  ;;  %v61_v23 = vld [vmem:[#allocation5 + $0x40] sm:$0xff] }
  0x2d   :  { %133 = vmatprep.subr.mxu0 %v70_v13  ;;  %204 = vmatprep.subr.mxu1 %v72_v14  ;;  %v63_v24 = vld [vmem:[#allocation5 + $0x50] sm:$0xff]  ;;  %v58_v25 = vld [vmem:[#allocation5 + $0x28] sm:$0xff]  ;;  %v60_v26 = vld [vmem:[#allocation5 + $0x38] sm:$0xff]  ;;  %p350_p5 = pnand %p349_p4, %p343_p1 }
  0x2e   :  { %134 = vmatpush1.msra.mxu0 %v69_v15  ;;  %205 = vmatpush1.msra.mxu1 %v71_v16  ;;  %v57_v27 = vld [vmem:[#allocation5 + $0x20] sm:$0xff]  ;;  %v59_v28 = vld [vmem:[#allocation5 + $0x30] sm:$0xff]  ;;  %v54_v29 = vld [vmem:[#allocation5 + $0x8] sm:$0xff] }
  0x2f   :  { %135 = vmatprep.subr.mxu0 %v66_v17  ;;  %206 = vmatprep.subr.mxu1 %v68_v18  ;;  %v56_v30 = vld [vmem:[#allocation5 + $0x18] sm:$0xff]  ;;  %v53_v31 = vld [vmem:[#allocation5] sm:$0xff]  ;;  %v55_v32 = vld [vmem:[#allocation5 + $0x10] sm:$0xff] }
  0x30   :  { %136 = vmatpush1.msra.mxu0 %v65_v19  ;;  %207 = vmatpush1.msra.mxu1 %v67_v20  ;;  %v52_v33 = vld [vmem:[#allocation2] sm:$0xff]  ;;  %v85_v38 = vld [vmem:[#allocation7] sm:$0xf] }
  0x31   :  { %137 = vmatprep.subr.mxu0 %v62_v21  ;;  %208 = vmatprep.subr.mxu1 %v64_v22  ;;  %v90_v41 = vrot.slane %v85_v38, %v89_v36  ;;  %v98_v42 = vrot.slane %v85_v38, %v97_v37  ;;  %v94_v43 = vrot.slane %v85_v38, %v93_v39 }
  0x32   :  { %138 = vmatpush1.msra.mxu0 %v61_v23  ;;  %209 = vmatpush1.msra.mxu1 %v63_v24  ;;  %v102_v44 = vrot.slane %v85_v38, %v101_v40 }
  0x33   :  { %139 = vmatprep.subr.mxu0 %v58_v25  ;;  %210 = vmatprep.subr.mxu1 %v60_v26 }
  0x34   :  { %140 = vmatpush1.msra.mxu0 %v57_v27  ;;  %211 = vmatpush1.msra.mxu1 %v59_v28 }
  0x35   :  { %141 = vmatprep.subr.mxu0 %v54_v29  ;;  %212 = vmatprep.subr.mxu1 %v56_v30 }
  0x36   :  { %142 = vmatpush1.msra.mxu0 %v53_v31  ;;  %213 = vmatpush1.msra.mxu1 %v55_v32 }
  0x37   :  { %273 = vmatmul.mubr.msk.f32.vlgmr.msra.gmra.mxu0 %vm107_vm0, %v52_v33  ;;  %274 = vmatmul.mubr.msk.f32.vlgmr.msra.gmra.mxu1 %vm107_vm0, %v52_v33 }
  0xf7   :  { %v177_v45 = vpop.f32.mrf.mxu0  ;;  %v248_v46 = vpop.f32.mrf.mxu1 }
  0xf8   :  { %v178_v47 = vadd.f32 %v177_v45, %v90_v41  ;;  %v249_v48 = vadd.f32 %v248_v46, %v98_v42 }
  0xf9   :  { %v179_v49 = vpop.f32.mrf.mxu0  ;;  %v250_v50 = vpop.f32.mrf.mxu1 }
  0xfa   :  { %253 = vst [vmem:[#allocation8] sm:$0xff] %v178_v47  ;;  %255 = vst [vmem:[#allocation8 + $0x10] sm:$0xff] %v249_v48  ;;  %v180_v51 = vadd.f32 %v179_v49, %v94_v43  ;;  %v251_v52 = vadd.f32 %v250_v50, %v102_v44 }
  0xfc   :  { %254 = vst [vmem:[#allocation8 + $0x8] sm:$0xff] %v180_v51  ;;  %256 = vst [vmem:[#allocation8 + $0x18] sm:$0xff] %v251_v52 }
  0xfd   :  { %353 = shalt.err (!%p350_p5)
}
  0xfe   :  { %266 = dma.vmem_to_hbm [thread:$0]  %s264_s2, 512, %s410_s3, [#allocation4]  }
  0xff   :  { %366 = dma.done.wait [#allocation4], 512  }
 0x100   :  { %367 = vsyncadd [#allocation4], 4294966784 }
 0x101   :  { %270 = vsyncpa [#allocation3], 1 }
 0x102   :  { %271 = vsyncpa [#allocation6], 1 }
 0x103   :  { %272 = vsyncpa [#allocation4], 1 }

</bundles_post_ra>
